<compile_context>
chip_gen: v7x
topology: tpu7x:2x2x1
jax: 0.10.0
libtpu: 0.0.40
codegen_flags: <defaults>
</compile_context>

<pallas_src>
import functools

import jax
import jax.numpy as jnp
from jax.experimental import pallas as pl
from jax.experimental.pallas import tpu as pltpu

EPS = 1e-5  # torch.nn.LayerNorm default eps


def _round_up(n, m):
    return ((n + m - 1) // m) * m


def mlp_kernel(x_ref,
               w1_ref, b1_ref, g1_ref, beta1_ref,
               w2_ref, b2_ref, g2_ref, beta2_ref,
               w3_ref, b3_ref,
               o_ref):
    def layernorm_relu(h, g, beta):
        # Two-pass variance (numerically safe); all math in f32.
        mu = jnp.mean(h, axis=-1, keepdims=True)
        var = jnp.mean(jnp.square(h - mu), axis=-1, keepdims=True)
        h = (h - mu) * jax.lax.rsqrt(var + EPS) * g + beta
        return jnp.maximum(h, 0.0)

    x = x_ref[...]  # bf16 (or f32) tile of rows

    # ---- Linear 1 + LayerNorm + ReLU (MXU matmul, f32 accumulation) ----
    h = jnp.dot(x, w1_ref[...], preferred_element_type=jnp.float32) + b1_ref[...]
    h = layernorm_relu(h, g1_ref[...], beta1_ref[...])

    # ---- Linear 2 + LayerNorm + ReLU ----
    h = jnp.dot(h, w2_ref[...], preferred_element_type=jnp.float32) + b2_ref[...]
    h = layernorm_relu(h, g2_ref[...], beta2_ref[...])

    # ---- Linear 3 (output projection; (bm, out_dim) block with out_dim equal
    #      to the full array dim -> layout-legal, no padding, minimal HBM
    #      writeback bytes) ----
    out = jnp.dot(h, w3_ref[...], preferred_element_type=jnp.float32) + b3_ref[...]
    o_ref[...] = out.astype(o_ref.dtype)


@functools.partial(jax.jit, static_argnames=("block_m", "param_dtype"))
def mlp_forward(x, params, block_m=2048, param_dtype=jnp.bfloat16):
    """Fused MLP forward.

    x and the weight matrices are cast to `param_dtype` (bf16 by default) at
    rest to halve the dominant HBM streams; matmul accumulation and all
    LayerNorm math remain f32 inside the kernel. Pass param_dtype=jnp.float32
    for bit-faithful f32 semantics.
    """
    (w1, b1, g1, be1, w2, b2, g2, be2, w3, b3) = params
    B, in_dim = x.shape
    out_dim = w3.shape[1]

    # Cast the big streams (x, weights) to the storage dtype; keep biases and
    # LayerNorm affine params in f32 (tiny, and they feed f32 elementwise math).
    x = x.astype(param_dtype)
    w1 = w1.astype(param_dtype)
    w2 = w2.astype(param_dtype)
    w3 = w3.astype(param_dtype)

    # Batch tile: big enough to amortize per-grid-step overhead, but capped so
    # the grid has >= 2 steps (when layout allows) for v7x's two TensorCores.
    bm = min(block_m, _round_up(pl.cdiv(B, 2), 8))
    if bm >= B:
        bm = B  # single full-extent tile (always layout-legal)
    grid = (pl.cdiv(B, bm),)

    def row_spec(d):
        # TODO(synk): if xprof shows exposed input DMA at large B, add
        # pipeline_mode=pl.Buffered(3) on the x spec only.
        return pl.BlockSpec((bm, d), lambda i: (i, 0))

    def resident(a):
        # Constant index_map -> param stays VMEM-resident across all batch
        # tiles (no per-step re-DMA).
        return pl.BlockSpec(a.shape, lambda i: (0,) * a.ndim)

    in_specs = [row_spec(in_dim),
                resident(w1), resident(b1), resident(g1), resident(be1),
                resident(w2), resident(b2), resident(g2), resident(be2),
                resident(w3), resident(b3)]

    return pl.pallas_call(
        mlp_kernel,
        out_shape=jax.ShapeDtypeStruct((B, out_dim), jnp.float32),
        grid=grid,
        in_specs=in_specs,
        out_specs=row_spec(out_dim),
        compiler_params=pltpu.CompilerParams(
            dimension_semantics=("parallel",),  # shard batch tiles across TCs
        ),
    )(x, w1, b1, g1, be1, w2, b2, g2, be2, w3, b3)


def init_params(key, input_dim, hidden_dim, output_dim):
    """Deterministic init mimicking PyTorch defaults (uniform +/- 1/sqrt(fan_in))."""
    h2 = hidden_dim // 2
    in1 = input_dim + 1
    keys = jax.random.split(key, 6)

    def lin(kw, kb, fan_in, fan_out):
        bound = 1.0 / jnp.sqrt(fan_in)
        w = jax.random.uniform(kw, (fan_in, fan_out), jnp.float32, -bound, bound)
        b = jax.random.uniform(kb, (1, fan_out), jnp.float32, -bound, bound)
        return w, b

    w1, b1 = lin(keys[0], keys[1], in1, h2)
    w2, b2 = lin(keys[2], keys[3], h2, h2)
    w3, b3 = lin(keys[4], keys[5], h2, output_dim)

    # LayerNorm affine params: gamma=1, beta=0 (PyTorch default init).
    g1 = jnp.ones((1, h2), jnp.float32)
    be1 = jnp.zeros((1, h2), jnp.float32)
    g2 = jnp.ones((1, h2), jnp.float32)
    be2 = jnp.zeros((1, h2), jnp.float32)

    return (w1, b1, g1, be1, w2, b2, g2, be2, w3, b3)


def mlp_reference(x, params, param_dtype=jnp.float32):
    """Pure-JAX reference. `param_dtype` matches the kernel's at-rest casting
    so the comparison isolates kernel correctness (not storage precision)."""
    (w1, b1, g1, be1, w2, b2, g2, be2, w3, b3) = params
    cast = lambda a: a.astype(param_dtype).astype(jnp.float32)
    x, w1, w2, w3 = cast(x), cast(w1), cast(w2), cast(w3)

    def ln(h, g, be):
        mu = jnp.mean(h, -1, keepdims=True)
        var = jnp.mean(jnp.square(h - mu), -1, keepdims=True)
        return (h - mu) * jax.lax.rsqrt(var + EPS) * g + be

    h = jnp.maximum(ln(x @ w1 + b1, g1, be1), 0.0)
    h = jnp.maximum(ln(h @ w2 + b2, g2, be2), 0.0)
    return h @ w3 + b3


if __name__ == "__main__":
    # Small shapes consistent with the module's forward.
    batch = 8
    input_dim = 31       # first Linear sees input_dim + 1 = 32 features
    hidden_dim = 64      # hidden_dim // 2 = 32
    output_dim = 16

    key = jax.random.PRNGKey(0)
    kx, kp = jax.random.split(key)
    x = jax.random.normal(kx, (batch, input_dim + 1), jnp.float32)
    params = init_params(kp, input_dim, hidden_dim, output_dim)

    # bf16-at-rest path (default) vs. a reference with matching casts.
    out = mlp_forward(x, params)
    out = jax.block_until_ready(out)
    ref = mlp_reference(x, params, param_dtype=jnp.bfloat16)
    assert out.shape == (batch, output_dim)
    assert jnp.allclose(out, ref, atol=1e-3, rtol=1e-3)

    # Full-f32 path vs. f32 reference (strict semantics check).
    out_f32 = jax.block_until_ready(mlp_forward(x, params, param_dtype=jnp.float32))
    ref_f32 = mlp_reference(x, params, param_dtype=jnp.float32)
    assert jnp.allclose(out_f32, ref_f32, atol=1e-4, rtol=1e-4)

    print("KERNEL_OK")
</pallas_src>

<mosaic_0001>
module attributes {stable_mosaic.version = 11 : i64} {
  func.func @mlp_kernel(%arg0: i32, %arg1: memref<8x32xbf16, #tpu.memory_space<vmem>>, %arg2: memref<32x32xbf16, #tpu.memory_space<vmem>>, %arg3: memref<1x32xf32, #tpu.memory_space<vmem>>, %arg4: memref<1x32xf32, #tpu.memory_space<vmem>>, %arg5: memref<1x32xf32, #tpu.memory_space<vmem>>, %arg6: memref<32x32xbf16, #tpu.memory_space<vmem>>, %arg7: memref<1x32xf32, #tpu.memory_space<vmem>>, %arg8: memref<1x32xf32, #tpu.memory_space<vmem>>, %arg9: memref<1x32xf32, #tpu.memory_space<vmem>>, %arg10: memref<32x16xbf16, #tpu.memory_space<vmem>>, %arg11: memref<1x16xf32, #tpu.memory_space<vmem>>, %arg12: memref<8x16xf32, #tpu.memory_space<vmem>>) attributes {dimension_semantics = [#tpu.dimension_semantics<parallel>], iteration_bounds = array<i64: 1>, scalar_prefetch = 0 : i64, scratch_operands = 0 : i64, tpu.core_type = #tpu.core_type<tc>, window_params = [{transform_indices = @transform_0, window_bounds = array<i64: 8, 32>}, {pipeline_mode = #tpu.pipeline_mode<synchronous>, transform_indices = @transform_1, window_bounds = array<i64: 32, 32>}, {pipeline_mode = #tpu.pipeline_mode<synchronous>, transform_indices = @transform_2, window_bounds = array<i64: 1, 32>}, {pipeline_mode = #tpu.pipeline_mode<synchronous>, transform_indices = @transform_3, window_bounds = array<i64: 1, 32>}, {pipeline_mode = #tpu.pipeline_mode<synchronous>, transform_indices = @transform_4, window_bounds = array<i64: 1, 32>}, {pipeline_mode = #tpu.pipeline_mode<synchronous>, transform_indices = @transform_5, window_bounds = array<i64: 32, 32>}, {pipeline_mode = #tpu.pipeline_mode<synchronous>, transform_indices = @transform_6, window_bounds = array<i64: 1, 32>}, {pipeline_mode = #tpu.pipeline_mode<synchronous>, transform_indices = @transform_7, window_bounds = array<i64: 1, 32>}, {pipeline_mode = #tpu.pipeline_mode<synchronous>, transform_indices = @transform_8, window_bounds = array<i64: 1, 32>}, {pipeline_mode = #tpu.pipeline_mode<synchronous>, transform_indices = @transform_9, window_bounds = array<i64: 32, 16>}, {pipeline_mode = #tpu.pipeline_mode<synchronous>, transform_indices = @transform_10, window_bounds = array<i64: 1, 16>}, {transform_indices = @transform_11, window_bounds = array<i64: 8, 16>}]} {
    %c0 = arith.constant 0 : index
    %c0_0 = arith.constant 0 : index
    %0 = vector.load %arg1[%c0, %c0_0] : memref<8x32xbf16, #tpu.memory_space<vmem>>, vector<8x32xbf16>
    %c0_1 = arith.constant 0 : index
    %c0_2 = arith.constant 0 : index
    %1 = vector.load %arg2[%c0_1, %c0_2] : memref<32x32xbf16, #tpu.memory_space<vmem>>, vector<32x32xbf16>
    %cst = arith.constant dense<0.000000e+00> : vector<8x32xf32>
    %2 = tpu.matmul %0, %1, %cst {dimension_numbers = #tpu.dot_dimension_numbers<[1], [0], [0], [1], [0, 0, 1, 1], [], []>} : vector<8x32xbf16>, vector<32x32xbf16>, vector<8x32xf32> -> vector<8x32xf32>
    %c0_3 = arith.constant 0 : index
    %c0_4 = arith.constant 0 : index
    %3 = vector.load %arg3[%c0_3, %c0_4] : memref<1x32xf32, #tpu.memory_space<vmem>>, vector<1x32xf32>
    %4 = vector.broadcast %3 : vector<1x32xf32> to vector<8x32xf32>
    %5 = arith.addf %2, %4 : vector<8x32xf32>
    %c0_5 = arith.constant 0 : index
    %c0_6 = arith.constant 0 : index
    %6 = vector.load %arg4[%c0_5, %c0_6] : memref<1x32xf32, #tpu.memory_space<vmem>>, vector<1x32xf32>
    %c0_7 = arith.constant 0 : index
    %c0_8 = arith.constant 0 : index
    %7 = vector.load %arg5[%c0_7, %c0_8] : memref<1x32xf32, #tpu.memory_space<vmem>>, vector<1x32xf32>
    %cst_9 = arith.constant dense<0.000000e+00> : vector<8xf32>
    %8 = vector.multi_reduction <add>, %5, %cst_9 [1] : vector<8x32xf32> to vector<8xf32>
    %9 = vector.shape_cast %8 : vector<8xf32> to vector<8x1xf32>
    %cst_10 = arith.constant 3.200000e+01 : f32
    %10 = vector.broadcast %cst_10 : f32 to vector<8x1xf32>
    %11 = arith.divf %9, %10 : vector<8x1xf32>
    %12 = vector.broadcast %11 : vector<8x1xf32> to vector<8x32xf32>
    %13 = arith.subf %5, %12 : vector<8x32xf32>
    %14 = arith.mulf %13, %13 : vector<8x32xf32>
    %cst_11 = arith.constant dense<0.000000e+00> : vector<8xf32>
    %15 = vector.multi_reduction <add>, %14, %cst_11 [1] : vector<8x32xf32> to vector<8xf32>
    %16 = vector.shape_cast %15 : vector<8xf32> to vector<8x1xf32>
    %cst_12 = arith.constant 3.200000e+01 : f32
    %17 = vector.broadcast %cst_12 : f32 to vector<8x1xf32>
    %18 = arith.divf %16, %17 : vector<8x1xf32>
    %19 = vector.broadcast %11 : vector<8x1xf32> to vector<8x32xf32>
    %20 = arith.subf %5, %19 : vector<8x32xf32>
    %cst_13 = arith.constant 9.99999974E-6 : f32
    %21 = vector.broadcast %cst_13 : f32 to vector<8x1xf32>
    %22 = arith.addf %18, %21 : vector<8x1xf32>
    %23 = math.rsqrt %22 : vector<8x1xf32>
    %24 = vector.broadcast %23 : vector<8x1xf32> to vector<8x32xf32>
    %25 = arith.mulf %20, %24 : vector<8x32xf32>
    %26 = vector.broadcast %6 : vector<1x32xf32> to vector<8x32xf32>
    %27 = arith.mulf %25, %26 : vector<8x32xf32>
    %28 = vector.broadcast %7 : vector<1x32xf32> to vector<8x32xf32>
    %29 = arith.addf %27, %28 : vector<8x32xf32>
    %cst_14 = arith.constant 0.000000e+00 : f32
    %30 = vector.broadcast %cst_14 : f32 to vector<8x32xf32>
    %31 = arith.maximumf %29, %30 : vector<8x32xf32>
    %c0_15 = arith.constant 0 : index
    %c0_16 = arith.constant 0 : index
    %32 = vector.load %arg6[%c0_15, %c0_16] : memref<32x32xbf16, #tpu.memory_space<vmem>>, vector<32x32xbf16>
    %cst_17 = arith.constant dense<0.000000e+00> : vector<8x32xf32>
    %33 = tpu.matmul %31, %32, %cst_17 {dimension_numbers = #tpu.dot_dimension_numbers<[1], [0], [0], [1], [0, 0, 1, 1], [], []>} : vector<8x32xf32>, vector<32x32xbf16>, vector<8x32xf32> -> vector<8x32xf32>
    %c0_18 = arith.constant 0 : index
    %c0_19 = arith.constant 0 : index
    %34 = vector.load %arg7[%c0_18, %c0_19] : memref<1x32xf32, #tpu.memory_space<vmem>>, vector<1x32xf32>
    %35 = vector.broadcast %34 : vector<1x32xf32> to vector<8x32xf32>
    %36 = arith.addf %33, %35 : vector<8x32xf32>
    %c0_20 = arith.constant 0 : index
    %c0_21 = arith.constant 0 : index
    %37 = vector.load %arg8[%c0_20, %c0_21] : memref<1x32xf32, #tpu.memory_space<vmem>>, vector<1x32xf32>
    %c0_22 = arith.constant 0 : index
    %c0_23 = arith.constant 0 : index
    %38 = vector.load %arg9[%c0_22, %c0_23] : memref<1x32xf32, #tpu.memory_space<vmem>>, vector<1x32xf32>
    %cst_24 = arith.constant dense<0.000000e+00> : vector<8xf32>
    %39 = vector.multi_reduction <add>, %36, %cst_24 [1] : vector<8x32xf32> to vector<8xf32>
    %40 = vector.shape_cast %39 : vector<8xf32> to vector<8x1xf32>
    %cst_25 = arith.constant 3.200000e+01 : f32
    %41 = vector.broadcast %cst_25 : f32 to vector<8x1xf32>
    %42 = arith.divf %40, %41 : vector<8x1xf32>
    %43 = vector.broadcast %42 : vector<8x1xf32> to vector<8x32xf32>
    %44 = arith.subf %36, %43 : vector<8x32xf32>
    %45 = arith.mulf %44, %44 : vector<8x32xf32>
    %cst_26 = arith.constant dense<0.000000e+00> : vector<8xf32>
    %46 = vector.multi_reduction <add>, %45, %cst_26 [1] : vector<8x32xf32> to vector<8xf32>
    %47 = vector.shape_cast %46 : vector<8xf32> to vector<8x1xf32>
    %cst_27 = arith.constant 3.200000e+01 : f32
    %48 = vector.broadcast %cst_27 : f32 to vector<8x1xf32>
    %49 = arith.divf %47, %48 : vector<8x1xf32>
    %50 = vector.broadcast %42 : vector<8x1xf32> to vector<8x32xf32>
    %51 = arith.subf %36, %50 : vector<8x32xf32>
    %cst_28 = arith.constant 9.99999974E-6 : f32
    %52 = vector.broadcast %cst_28 : f32 to vector<8x1xf32>
    %53 = arith.addf %49, %52 : vector<8x1xf32>
    %54 = math.rsqrt %53 : vector<8x1xf32>
    %55 = vector.broadcast %54 : vector<8x1xf32> to vector<8x32xf32>
    %56 = arith.mulf %51, %55 : vector<8x32xf32>
    %57 = vector.broadcast %37 : vector<1x32xf32> to vector<8x32xf32>
    %58 = arith.mulf %56, %57 : vector<8x32xf32>
    %59 = vector.broadcast %38 : vector<1x32xf32> to vector<8x32xf32>
    %60 = arith.addf %58, %59 : vector<8x32xf32>
    %cst_29 = arith.constant 0.000000e+00 : f32
    %61 = vector.broadcast %cst_29 : f32 to vector<8x32xf32>
    %62 = arith.maximumf %60, %61 : vector<8x32xf32>
    %c0_30 = arith.constant 0 : index
    %c0_31 = arith.constant 0 : index
    %63 = vector.load %arg10[%c0_30, %c0_31] : memref<32x16xbf16, #tpu.memory_space<vmem>>, vector<32x16xbf16>
    %cst_32 = arith.constant dense<0.000000e+00> : vector<8x16xf32>
    %64 = tpu.matmul %62, %63, %cst_32 {dimension_numbers = #tpu.dot_dimension_numbers<[1], [0], [0], [1], [0, 0, 1, 1], [], []>} : vector<8x32xf32>, vector<32x16xbf16>, vector<8x16xf32> -> vector<8x16xf32>
    %c0_33 = arith.constant 0 : index
    %c0_34 = arith.constant 0 : index
    %65 = vector.load %arg11[%c0_33, %c0_34] : memref<1x16xf32, #tpu.memory_space<vmem>>, vector<1x16xf32>
    %66 = vector.broadcast %65 : vector<1x16xf32> to vector<8x16xf32>
    %67 = arith.addf %64, %66 : vector<8x16xf32>
    %c0_35 = arith.constant 0 : index
    %c0_36 = arith.constant 0 : index
    %68 = vector.load %arg12[%c0_35, %c0_36] : memref<8x16xf32, #tpu.memory_space<vmem>>, vector<8x16xf32>
    tpu.vector_store %arg12[%c0_35, %c0_36], %67 {strides = array<i32>} : memref<8x16xf32, #tpu.memory_space<vmem>>, vector<8x16xf32>,
    return
  }
  func.func @transform_0(%arg0: i32) -> (i32, i32) {
    %c0_i32 = arith.constant 0 : i32
    %c0_i32_0 = arith.constant 0 : i32
    return %arg0, %c0_i32 : i32, i32
  }
  func.func @transform_1(%arg0: i32) -> (i32, i32) {
    %c0_i32 = arith.constant 0 : i32
    %c0_i32_0 = arith.constant 0 : i32
    %c0_i32_1 = arith.constant 0 : i32
    return %c0_i32, %c0_i32_0 : i32, i32
  }
  func.func @transform_2(%arg0: i32) -> (i32, i32) {
    %c0_i32 = arith.constant 0 : i32
    %c0_i32_0 = arith.constant 0 : i32
    %c0_i32_1 = arith.constant 0 : i32
    return %c0_i32, %c0_i32_0 : i32, i32
  }
  func.func @transform_3(%arg0: i32) -> (i32, i32) {
    %c0_i32 = arith.constant 0 : i32
    %c0_i32_0 = arith.constant 0 : i32
    %c0_i32_1 = arith.constant 0 : i32
    return %c0_i32, %c0_i32_0 : i32, i32
  }
  func.func @transform_4(%arg0: i32) -> (i32, i32) {
    %c0_i32 = arith.constant 0 : i32
    %c0_i32_0 = arith.constant 0 : i32
    %c0_i32_1 = arith.constant 0 : i32
    return %c0_i32, %c0_i32_0 : i32, i32
  }
  func.func @transform_5(%arg0: i32) -> (i32, i32) {
    %c0_i32 = arith.constant 0 : i32
    %c0_i32_0 = arith.constant 0 : i32
    %c0_i32_1 = arith.constant 0 : i32
    return %c0_i32, %c0_i32_0 : i32, i32
  }
  func.func @transform_6(%arg0: i32) -> (i32, i32) {
    %c0_i32 = arith.constant 0 : i32
    %c0_i32_0 = arith.constant 0 : i32
    %c0_i32_1 = arith.constant 0 : i32
    return %c0_i32, %c0_i32_0 : i32, i32
  }
  func.func @transform_7(%arg0: i32) -> (i32, i32) {
    %c0_i32 = arith.constant 0 : i32
    %c0_i32_0 = arith.constant 0 : i32
    %c0_i32_1 = arith.constant 0 : i32
    return %c0_i32, %c0_i32_0 : i32, i32
  }
  func.func @transform_8(%arg0: i32) -> (i32, i32) {
    %c0_i32 = arith.constant 0 : i32
    %c0_i32_0 = arith.constant 0 : i32
    %c0_i32_1 = arith.constant 0 : i32
    return %c0_i32, %c0_i32_0 : i32, i32
  }
  func.func @transform_9(%arg0: i32) -> (i32, i32) {
    %c0_i32 = arith.constant 0 : i32
    %c0_i32_0 = arith.constant 0 : i32
    %c0_i32_1 = arith.constant 0 : i32
    return %c0_i32, %c0_i32_0 : i32, i32
  }
  func.func @transform_10(%arg0: i32) -> (i32, i32) {
    %c0_i32 = arith.constant 0 : i32
    %c0_i32_0 = arith.constant 0 : i32
    %c0_i32_1 = arith.constant 0 : i32
    return %c0_i32, %c0_i32_0 : i32, i32
  }
  func.func @transform_11(%arg0: i32) -> (i32, i32) {
    %c0_i32 = arith.constant 0 : i32
    %c0_i32_0 = arith.constant 0 : i32
    return %arg0, %c0_i32 : i32, i32
  }
}

</mosaic_0001>

<bundles_post_ra>
// kernel: mlp_forward.1
= control target key start
LH: loop header
LB: loop body
LE: loop exit
PB: predicated region body
PF: predicated region fallthrough
CT: control target
= control target key end

     0   :  { %v397_v1 = vmov 0.0   ;;  %vm398_vm0 = vmmov 0   ;;  %s521_s0 = inlined_call_operand.vmem [shape: bf16[8,32], index: 0, kind: input, shape index: {}]   ;;  %s522_s1 = inlined_call_operand.vmem [shape: bf16[32,32], index: 1, kind: input, shape index: {}]   ;;  %s523_s2 = inlined_call_operand.vmem [shape: f32[1,32], index: 2, kind: input, shape index: {}]   ;;  %s524_s3 = inlined_call_operand.vmem [shape: f32[1,32], index: 3, kind: input, shape index: {}]   ;;  %s525_s4 = inlined_call_operand.vmem [shape: f32[1,32], index: 4, kind: input, shape index: {}]   ;;  %s526_s5 = inlined_call_operand.vmem [shape: bf16[32,32], index: 5, kind: input, shape index: {}]   ;;  %s527_s6 = inlined_call_operand.vmem [shape: f32[1,32], index: 6, kind: input, shape index: {}]   ;;  %s528_s7 = inlined_call_operand.vmem [shape: f32[1,32], index: 7, kind: input, shape index: {}]   ;;  %s529_s8 = inlined_call_operand.vmem [shape: f32[1,32], index: 8, kind: input, shape index: {}]   ;;  %s530_s9 = inlined_call_operand.vmem [shape: bf16[32,16], index: 9, kind: input, shape index: {}]   ;;  %s531_s10 = inlined_call_operand.vmem [shape: f32[1,16], index: 10, kind: input, shape index: {}]   ;;  %s532_s11 = inlined_call_operand.hbm [shape: f32[8,16], index: 11, kind: output, shape index: {}]  }
   0x1   :  { %v363_v0 = vld [vmem:[%s522_s1] sm:$0xff]   ;;  %338 = vmatprep.subr.bf16.mxu0 %v397_v1  ;;  %346 = vmatprep.subr.bf16.mxu1 %v397_v1  ;;  %v364_v2 = vld [vmem:[%s522_s1 + $0x8] sm:$0xff]  }
   0x2   :  { %339 = vmatpush3.bf16.msra.mxu0 %v363_v0  ;;  %342 = vmatprep.mubr.msk.bf16.mxu0 %vm398_vm0, %v397_v1 }
   0x3   :  { %340 = vmatprep.subr.bf16.mxu0 %v397_v1  ;;  %350 = vmatprep.mubr.msk.f32.mxu1 %vm398_vm0, %v397_v1 }
   0x4   :  { %16 = vsyncpa [#allocation3], 0  ;;  %v40_v3 = vld [vmem:[%s521_s0] sm:$0xf]  ;;  %vm64_vm1 = vcmask 261120   ;;  %v366_v17 = vld [vmem:[%s526_s5 + $0x8] sm:$0xff]  }
   0x5   :  { %v313_v4 = vld [vmem:[%s523_s2] ss:$0 sm:$0xff]  ;;  %v368_v39 = vld [vmem:[%s530_s9 + $0x8] sm:$0xff]   ;;  %s399_s18 = smov [#allocation2]   ;;  %vm297_vm2 = vcmask 130048  }
   0x6   :  { %341 = vmatpush3.bf16.msra.mxu0 %v364_v2  ;;  %v365_v16 = vld [vmem:[%s526_s5] sm:$0xff]   ;;  %s305_s19 = sshll.u32 %s399_s18, 4  ;;  %s306_s19 = int_to_ptr.vmem [resolvable:$true] %s305_s19 }
   0x7   :  { %353 = vmatprep.subr.bf16.mxu0 %v397_v1  ;;  %347 = vmatpush3.bf16.msra.mxu1 %v365_v16  ;;  %v317_v22 = vld [vmem:[%s524_s3] ss:$0 sm:$0xff]  ;;  %p378_p1 = scmp.lt.s32.totalorder %s306_s19, %s306_s19 }
   0x8   :  { %348 = vmatprep.subr.bf16.mxu1 %v397_v1  ;;  %v318_v24 = vld [vmem:[%s525_s4] ss:$0 sm:$0xff] }
   0x9   :  { %343 = vmatmul.mubr.msk.bf16.vlgmr.msra.gmra.mrb[0].mxu0 %vm64_vm1, %v40_v3  ;;  %v319_v28 = vld [vmem:[%s527_s6] ss:$0 sm:$0xff] }
   0xa   :  { %357 = vmatprep.mubr.msk.f32.mxu0 %vm398_vm0, %v397_v1  ;;  %v367_v38 = vld [vmem:[%s530_s9] sm:$0xff]  }
   0xb   :  { %349 = vmatpush3.bf16.msra.mxu1 %v366_v17  ;;  %354 = vmatpush3.bf16.msra.mxu0 %v367_v38  ;;  %v323_v44 = vld [vmem:[%s528_s7] ss:$0 sm:$0xff]  ;;  %s373_s7 = scalar_lea.vmem %s306_s19, 128 }
   0xc   :  { %355 = vmatprep.subr.bf16.mxu0 %v397_v1  ;;  %v324_v46 = vld [vmem:[%s529_s8] ss:$0 sm:$0xff]  ;;  %p374_p0 = scmp.ne.s32.totalorder %s306_s19, %s373_s7  ;;  %p379_p2 = scmp.lt.s32.totalorder %s373_s7, %s373_s7 }
   0xd   :  { %v325_v50 = vld [vmem:[%s531_s10] ss:$0 sm:$0xff] }
   0xe   :  { %p380_p3 = por %p379_p2, %p378_p1 }
   0xf   :  { %356 = vmatpush3.bf16.msra.mxu0 %v368_v39 }
  0x10   :  { %p381_p4 = pnand %p380_p3, %p374_p0 }
  0xdc   :  { %v102_v5 = vpop.f32.mrb[0].mxu0 }
  0xdd   :  { %v103_v6 = vadd.f32 %v313_v4, %v102_v5  ;;  %v344_v7 = vpop.f32.mrb[1].mxu0 }
  0xde   :  { %v105_v8 = vpop.f32.mrb[2].mxu0 }
  0xdf   :  { %v345_v9 = vpop.f32.mrb[3].mxu0  ;;  %v110_v10 = vsel %vm64_vm1, %v103_v6, 0.0 }
  0xe0   :  { %111 = vadd.xlane.f32.xlu0 %v110_v10 }
 0x16d   :  { %v112_v11 = vpop.xlane.xlu0 %111 }
 0x16e   :  { %v114_v12 = vmul.f32 0.03125, %v112_v11 }
 0x170   :  { %v115_v13 = vsub.f32 %v103_v6, %v114_v12 }
 0x172   :  { %v116_v14 = vmul.f32 %v115_v13, %v115_v13 }
 0x174   :  { %v117_v15 = vsel %vm64_vm1, %v116_v14, 0.0 }
 0x175   :  { %118 = vadd.xlane.f32.xlu0 %v117_v15 }
 0x202   :  { %v119_v18 = vpop.xlane.xlu0 %118 }
 0x203   :  { %v120_v19 = vmul.f32 0.03125, %v119_v18 }
 0x205   :  { %v121_v20 = vadd.f32 1e-05, %v120_v19 }
 0x207   :  { %369 = vrsqrt.f32 %v121_v20 }
 0x211   :  { %v370_v21 = vpop.eup %369 }
 0x212   :  { %v123_v23 = vmul.f32 %v370_v21, %v115_v13 }
 0x214   :  { %v130_v25 = vmul.f32 %v317_v22, %v123_v23 }
 0x216   :  { %v137_v26 = vadd.f32 %v318_v24, %v130_v25 }
 0x218   :  { %v138_v27 = vmax.f32 %v137_v26, 0.0 }
 0x21a   :  { %351 = vmatmul.mubr.msk.f32.vlgmr.msra.gmra.mrb[0].mxu1 %vm64_vm1, %v138_v27 }
 0x2ed   :  { %v199_v29 = vpop.f32.mrb[0].mxu1 }
 0x2ee   :  { %v200_v30 = vadd.f32 %v319_v28, %v199_v29  ;;  %v352_v31 = vpop.f32.mrb[1].mxu1 }
 0x2f0   :  { %v205_v32 = vsel %vm64_vm1, %v200_v30, 0.0 }
 0x2f1   :  { %206 = vadd.xlane.f32.xlu1 %v205_v32 }
 0x37e   :  { %v207_v33 = vpop.xlane.xlu1 %206 }
 0x37f   :  { %v208_v34 = vmul.f32 0.03125, %v207_v33 }
 0x381   :  { %v209_v35 = vsub.f32 %v200_v30, %v208_v34 }
 0x383   :  { %v210_v36 = vmul.f32 %v209_v35, %v209_v35 }
 0x385   :  { %v211_v37 = vsel %vm64_vm1, %v210_v36, 0.0 }
 0x386   :  { %212 = vadd.xlane.f32.xlu1 %v211_v37 }
 0x413   :  { %v213_v40 = vpop.xlane.xlu1 %212 }
 0x414   :  { %v214_v41 = vmul.f32 0.03125, %v213_v40 }
 0x416   :  { %v215_v42 = vadd.f32 1e-05, %v214_v41 }
 0x418   :  { %371 = vrsqrt.f32 %v215_v42 }
 0x422   :  { %v372_v43 = vpop.eup %371 }
 0x423   :  { %v217_v45 = vmul.f32 %v372_v43, %v209_v35 }
 0x425   :  { %v224_v47 = vmul.f32 %v323_v44, %v217_v45 }
 0x427   :  { %v231_v48 = vadd.f32 %v324_v46, %v224_v47 }
 0x429   :  { %v232_v49 = vmax.f32 %v231_v48, 0.0 }
 0x42b   :  { %358 = vmatmul.mubr.msk.f32.vlgmr.msra.gmra.mrb[4].mxu0 %vm64_vm1, %v232_v49 }
 0x4fe   :  { %v293_v51 = vpop.f32.mrb[4].mxu0 }
 0x4ff   :  { %v294_v52 = vadd.f32 %v325_v50, %v293_v51  ;;  %v359_v53 = vpop.f32.mrb[5].mxu0 }
 0x501   :  { %298 = vst.msk [vmem:[#allocation2] sm:$0xff] %vm297_vm2, %v294_v52 }
 0x502   :  { %384 = shalt.err (!%p381_p4)
}
 0x503   :  { %s385_s21 = scalar_lea.hbm %s532_s11, 128 }
 0x504   :  { %p386_p5 = scmp.ne.s32.totalorder %s532_s11, %s385_s21  ;;  %p389_p6 = scmp.lt.u32.totalorder %s385_s21, %s532_s11 }
 0x506   :  { %p391_p7 = pnand %p389_p6, %p386_p5 }
 0x508   :  { %394 = shalt.err (!%p391_p7)
}
 0x509   :  { %308 = dma.vmem_to_hbm [thread:$0]  %s306_s19, 128, %s532_s11, [#allocation3]  }
 0x50a   :  { %395 = dma.done.wait [#allocation3], 128  }
 0x50b   :  { %396 = vsyncadd [#allocation3], 4294967168 }
 0x50c   :  { %312 = vsyncpa [#allocation3], 1 }

</bundles_post_ra>
